<compile_context>
chip_gen: v6e
topology: v6e:2x2x1
jax: 0.10.0
libtpu: 0.0.40
codegen_flags: <defaults>
</compile_context>

<pallas_src>
import jax
import jax.numpy as jnp
from jax import lax
from jax.experimental import pallas as pl
from jax.experimental.pallas import tpu as pltpu


def _round_up(x: int, m: int) -> int:
    return ((x + m - 1) // m) * m


def _static_int_pow(v, n: int):
    """v ** n for a static non-negative integer n, as plain multiplies."""
    if n == 0:
        return jnp.ones_like(v)
    acc = None
    base = v
    while n:
        if n & 1:
            acc = base if acc is None else acc * base
        n >>= 1
        if n:
            base = base * base
    return acc


def _make_focal_kernel(gamma: float, use_alpha: bool):
    gamma_is_int = float(gamma).is_integer() and gamma >= 0

    def body(logits_ref, targets_ref, alpha_ref, out_ref):
        x = logits_ref[...].astype(jnp.float32)        # [TB, C]
        t = targets_ref[...]                           # [TB, 1] int32

        # One-hot "hit" mask for the target-class gather.
        # NOTE: out-of-range targets (t < 0 or t >= C) silently give x_t = 0
        # (PyTorch's gather would raise) -- documented contract.
        col = lax.broadcasted_iota(jnp.int32, x.shape, 1)
        hit = col == t                                 # [TB, C] bool

        # Row-wise log-softmax evaluated only at the target class (no log_p tile).
        m = jnp.max(x, axis=1, keepdims=True)                          # [TB, 1]
        lse = jnp.log(jnp.sum(jnp.exp(x - m), axis=1, keepdims=True))  # [TB, 1]
        x_t = jnp.sum(jnp.where(hit, x, 0.0), axis=1, keepdims=True)   # [TB, 1]
        log_pt = (x_t - m) - lse                                       # [TB, 1]
        pt = jnp.exp(log_pt)

        one_minus_pt = jnp.maximum(1.0 - pt, 0.0)      # clamp: avoids NaN for frac gamma
        if gamma_is_int:
            focal = _static_int_pow(one_minus_pt, int(gamma))   # VPU multiplies
        else:
            focal = one_minus_pt ** gamma                       # rare non-integer path
        loss = -focal * log_pt                                  # [TB, 1]

        if use_alpha:
            loss = alpha_ref[...] * loss               # alpha_t pre-gathered in wrapper

        out_ref[...] = loss                            # direct [TB, 1] column store

    if use_alpha:
        def kernel(logits_ref, targets_ref, alpha_ref, out_ref):
            body(logits_ref, targets_ref, alpha_ref, out_ref)
    else:
        def kernel(logits_ref, targets_ref, out_ref):
            body(logits_ref, targets_ref, None, out_ref)
    return kernel


def _vmem_budget():
    """Generation-aware (max_block budget, vmem_limit ceiling, two-TC hint)."""
    vmem_cap = None
    try:
        info = pltpu.get_tpu_info()
        vmem_cap = getattr(info, "vmem_capacity_bytes", None)
    except Exception:
        vmem_cap = None
    if vmem_cap is not None and vmem_cap >= (96 << 20):
        # v5e / v6e: 128 MiB physical VMEM, single TensorCore per chip.
        return (96 << 20), False
    # v7x (64 MiB per-TC, 2 TCs) or unknown hardware: conservative caps.
    two_tc = vmem_cap is not None
    return (40 << 20), two_tc


def focal_loss_pallas(logits, targets, alpha=None, gamma=2.0, reduction="mean",
                      block_rows=1024):
    """Pallas implementation of FocalLoss.forward.

    logits:  [B, C] float (f32 or bf16 -- upcast happens inside the kernel, so
             callers may keep logits bf16 in HBM and halve the dominant read).
    targets: [B]    int class indices
    alpha:   optional [C] per-class weights
    reduction: 'mean' | 'sum' | 'none'
    """
    assert block_rows > 0
    B, C = logits.shape
    itemsize = jnp.dtype(logits.dtype).itemsize

    # Sublane alignment for the packed dtype: (8,128) f32, (16,128) bf16, (32,128) int8.
    if itemsize >= 4:
        align = 8
    elif itemsize == 2:
        align = 16
    else:
        align = 32

    vmem_ceiling, two_tc = _vmem_budget()

    # Batch-tile size derived from a VMEM budget: double-buffered logits block
    # (input dtype) plus ~3 f32-sized compute temporaries per live block.
    C_lanes = _round_up(C, 128)
    bytes_per_row = 2 * itemsize * C_lanes + 3 * 4 * C_lanes
    data_budget = int(vmem_ceiling * 0.6)
    cap = max(align, ((data_budget // max(bytes_per_row, 1)) // align) * align)
    tb = max(align, min(_round_up(int(block_rows), align), cap))

    if B < align:
        tb = B                               # single full-array block (tiny batch)
    elif B < tb:
        tb = max(align, (B // align) * align)  # largest aligned tile; last block ragged

    num_tiles = pl.cdiv(B, tb)
    # v7x: make sure the "parallel" grid axis has >= 2 steps so both TCs get work.
    if two_tc and num_tiles == 1 and B >= 2 * align:
        tb_half = _round_up(pl.cdiv(B, 2), align)
        if align <= tb_half < tb:
            tb = tb_half
            num_tiles = pl.cdiv(B, tb)

    use_alpha = alpha is not None
    targets2d = targets.reshape(B, 1).astype(jnp.int32)

    in_specs = [
        pl.BlockSpec((tb, C), lambda i: (i, 0)),   # logits tile
        pl.BlockSpec((tb, 1), lambda i: (i, 0)),   # targets column (tiny)
    ]
    args = [logits, targets2d]
    if use_alpha:
        # Hoisted gather: a [B]-sized XLA gather is negligible HBM traffic and
        # removes one [tb,C] select + one cross-lane reduce per tile in-kernel.
        alpha_arr = jnp.asarray(alpha, dtype=jnp.float32)
        alpha_t = alpha_arr[targets.astype(jnp.int32)].reshape(B, 1)
        in_specs.append(pl.BlockSpec((tb, 1), lambda i: (i, 0)))
        args.append(alpha_t)

    out_rows = num_tiles * tb
    out_shape = jax.ShapeDtypeStruct((out_rows, 1), jnp.float32)
    out_spec = pl.BlockSpec((tb, 1), lambda i: (i, 0))

    # Honest VMEM estimate: lane-padded logits blocks (double-buffered) + f32
    # temps + small column blocks + headroom; clamped to the per-generation ceiling.
    blocks_bytes = tb * bytes_per_row + 6 * _round_up(max(tb, 8), 8) * 128 * 4
    vmem_limit = int(min(max(blocks_bytes + (4 << 20), 32 << 20), vmem_ceiling))

    cost = pl.CostEstimate(
        flops=int(10 * B * C),
        transcendentals=int(B * C + 3 * B),
        bytes_accessed=int(B * C * itemsize + B * 4 * (3 if use_alpha else 2)
                           + out_rows * 4),
    )

    kernel = _make_focal_kernel(float(gamma), use_alpha)

    out = pl.pallas_call(
        kernel,
        out_shape=out_shape,
        grid=(num_tiles,),
        in_specs=in_specs,
        out_specs=out_spec,
        compiler_params=pltpu.CompilerParams(
            dimension_semantics=("parallel",),     # lets v7x split tiles over 2 TCs
            vmem_limit_bytes=vmem_limit,
        ),
        cost_estimate=cost,
    )(*args)

    # Slice BEFORE reducing: rows >= B (ragged last tile) may hold garbage.
    per_row = out[:B, 0]
    if reduction == "mean":
        return per_row.mean()
    if reduction == "sum":
        return per_row.sum()
    return per_row


def focal_loss_ref(logits, targets, alpha=None, gamma=2.0, reduction="mean"):
    """Pure-JAX reference mirroring the PyTorch module."""
    log_p = jax.nn.log_softmax(logits.astype(jnp.float32), axis=1)
    log_pt = jnp.take_along_axis(log_p, targets.reshape(-1, 1), axis=1)[:, 0]
    pt = jnp.exp(log_pt)
    loss = -1.0 * (1.0 - pt) ** gamma * log_pt
    if alpha is not None:
        loss = jnp.asarray(alpha, dtype=jnp.float32)[targets] * loss
    if reduction == "mean":
        return loss.mean()
    if reduction == "sum":
        return loss.sum()
    return loss


if __name__ == "__main__":
    key = jax.random.PRNGKey(0)
    k1, k2, k3, k4, k5, k6 = jax.random.split(key, 6)

    # Case 1: module defaults (mean reduction) with per-class alpha.
    B, C = 8, 16
    logits = jax.random.normal(k1, (B, C), dtype=jnp.float32) * 3.0
    targets = jax.random.randint(k2, (B,), 0, C, dtype=jnp.int32)
    alpha = jnp.linspace(0.5, 1.5, C, dtype=jnp.float32)

    out = jax.block_until_ready(
        focal_loss_pallas(logits, targets, alpha=alpha, gamma=2.0, reduction="mean"))
    ref = focal_loss_ref(logits, targets, alpha=alpha, gamma=2.0, reduction="mean")
    assert jnp.allclose(out, ref, atol=1e-5, rtol=1e-5), (out, ref)

    # Case 2: per-example losses (reduction='none').
    out_n = jax.block_until_ready(
        focal_loss_pallas(logits, targets, alpha=alpha, gamma=2.0, reduction="none"))
    ref_n = focal_loss_ref(logits, targets, alpha=alpha, gamma=2.0, reduction="none")
    assert out_n.shape == (B,)
    assert jnp.allclose(out_n, ref_n, atol=1e-5, rtol=1e-5), (out_n, ref_n)

    # Case 3: multi-tile grid with a ragged last block (no alpha, sum reduction).
    B2, C2 = 40, 16
    logits2 = jax.random.normal(k3, (B2, C2), dtype=jnp.float32) * 2.0
    targets2 = jax.random.randint(k4, (B2,), 0, C2, dtype=jnp.int32)
    out_s = jax.block_until_ready(
        focal_loss_pallas(logits2, targets2, gamma=2.0, reduction="sum", block_rows=16))
    ref_s = focal_loss_ref(logits2, targets2, gamma=2.0, reduction="sum")
    assert jnp.allclose(out_s, ref_s, atol=1e-4, rtol=1e-5), (out_s, ref_s)

    # Case 4: bf16 logits (HBM-traffic halving path), non-integer gamma.
    B3, C3 = 64, 32
    logits3 = (jax.random.normal(k5, (B3, C3), dtype=jnp.float32) * 2.0).astype(jnp.bfloat16)
    targets3 = jax.random.randint(k6, (B3,), 0, C3, dtype=jnp.int32)
    out_b = jax.block_until_ready(
        focal_loss_pallas(logits3, targets3, gamma=1.5, reduction="mean"))
    ref_b = focal_loss_ref(logits3, targets3, gamma=1.5, reduction="mean")
    assert jnp.allclose(out_b, ref_b, atol=1e-4, rtol=1e-4), (out_b, ref_b)

    print("KERNEL_OK")
</pallas_src>

<mosaic_0001>
module attributes {stable_mosaic.version = 11 : i64} {
  func.func @kernel(%arg0: i32, %arg1: memref<8x16xf32, #tpu.memory_space<vmem>>, %arg2: memref<8x1xi32, #tpu.memory_space<vmem>>, %arg3: memref<8x1xf32, #tpu.memory_space<vmem>>, %arg4: memref<8x1xf32, #tpu.memory_space<vmem>>) attributes {dimension_semantics = [#tpu.dimension_semantics<parallel>], iteration_bounds = array<i64: 1>, scalar_prefetch = 0 : i64, scratch_operands = 0 : i64, tpu.core_type = #tpu.core_type<tc>, window_params = [{transform_indices = @transform_0, window_bounds = array<i64: 8, 16>}, {transform_indices = @transform_1, window_bounds = array<i64: 8, 1>}, {transform_indices = @transform_2, window_bounds = array<i64: 8, 1>}, {transform_indices = @transform_3, window_bounds = array<i64: 8, 1>}]} {
    %c0 = arith.constant 0 : index
    %c0_0 = arith.constant 0 : index
    %0 = vector.load %arg1[%c0, %c0_0] : memref<8x16xf32, #tpu.memory_space<vmem>>, vector<8x16xf32>
    %c0_1 = arith.constant 0 : index
    %c0_2 = arith.constant 0 : index
    %1 = vector.load %arg2[%c0_1, %c0_2] : memref<8x1xi32, #tpu.memory_space<vmem>>, vector<8x1xi32>
    %2 = tpu.iota {dimensions = array<i32: 1>} : vector<8x16xi32>
    %3 = vector.broadcast %1 : vector<8x1xi32> to vector<8x16xi32>
    %4 = arith.cmpi eq, %2, %3 : vector<8x16xi32>
    %cst = arith.constant dense<0xFF800000> : vector<8xf32>
    %5 = vector.multi_reduction <maximumf>, %0, %cst [1] : vector<8x16xf32> to vector<8xf32>
    %6 = vector.shape_cast %5 : vector<8xf32> to vector<8x1xf32>
    %7 = vector.broadcast %6 : vector<8x1xf32> to vector<8x16xf32>
    %8 = arith.subf %0, %7 : vector<8x16xf32>
    %9 = math.exp %8 : vector<8x16xf32>
    %cst_3 = arith.constant dense<0.000000e+00> : vector<8xf32>
    %10 = vector.multi_reduction <add>, %9, %cst_3 [1] : vector<8x16xf32> to vector<8xf32>
    %11 = vector.shape_cast %10 : vector<8xf32> to vector<8x1xf32>
    %12 = math.log %11 : vector<8x1xf32>
    %cst_4 = arith.constant 0.000000e+00 : f32
    %13 = vector.broadcast %cst_4 : f32 to vector<8x16xf32>
    %14 = arith.select %4, %0, %13 : vector<8x16xi1>, vector<8x16xf32>
    %cst_5 = arith.constant dense<0.000000e+00> : vector<8xf32>
    %15 = vector.multi_reduction <add>, %14, %cst_5 [1] : vector<8x16xf32> to vector<8xf32>
    %16 = vector.shape_cast %15 : vector<8xf32> to vector<8x1xf32>
    %17 = arith.subf %16, %6 : vector<8x1xf32>
    %18 = arith.subf %17, %12 : vector<8x1xf32>
    %19 = math.exp %18 : vector<8x1xf32>
    %cst_6 = arith.constant 1.000000e+00 : f32
    %20 = vector.broadcast %cst_6 : f32 to vector<8x1xf32>
    %21 = arith.subf %20, %19 : vector<8x1xf32>
    %cst_7 = arith.constant 0.000000e+00 : f32
    %22 = vector.broadcast %cst_7 : f32 to vector<8x1xf32>
    %23 = arith.maximumf %21, %22 : vector<8x1xf32>
    %24 = arith.mulf %23, %23 : vector<8x1xf32>
    %cst_8 = arith.constant 0.000000e+00 : f32
    %25 = vector.broadcast %cst_8 : f32 to vector<8x1xf32>
    %26 = arith.subf %25, %24 : vector<8x1xf32>
    %27 = arith.mulf %26, %18 : vector<8x1xf32>
    %c0_9 = arith.constant 0 : index
    %c0_10 = arith.constant 0 : index
    %28 = vector.load %arg3[%c0_9, %c0_10] : memref<8x1xf32, #tpu.memory_space<vmem>>, vector<8x1xf32>
    %29 = arith.mulf %28, %27 : vector<8x1xf32>
    %c0_11 = arith.constant 0 : index
    %c0_12 = arith.constant 0 : index
    %30 = vector.load %arg4[%c0_11, %c0_12] : memref<8x1xf32, #tpu.memory_space<vmem>>, vector<8x1xf32>
    tpu.vector_store %arg4[%c0_11, %c0_12], %29 {strides = array<i32>} : memref<8x1xf32, #tpu.memory_space<vmem>>, vector<8x1xf32>,
    return
  }
  func.func @transform_0(%arg0: i32) -> (i32, i32) {
    %c0_i32 = arith.constant 0 : i32
    %c0_i32_0 = arith.constant 0 : i32
    return %arg0, %c0_i32 : i32, i32
  }
  func.func @transform_1(%arg0: i32) -> (i32, i32) {
    %c0_i32 = arith.constant 0 : i32
    %c0_i32_0 = arith.constant 0 : i32
    return %arg0, %c0_i32 : i32, i32
  }
  func.func @transform_2(%arg0: i32) -> (i32, i32) {
    %c0_i32 = arith.constant 0 : i32
    %c0_i32_0 = arith.constant 0 : i32
    return %arg0, %c0_i32 : i32, i32
  }
  func.func @transform_3(%arg0: i32) -> (i32, i32) {
    %c0_i32 = arith.constant 0 : i32
    %c0_i32_0 = arith.constant 0 : i32
    return %arg0, %c0_i32 : i32, i32
  }
}

</mosaic_0001>

<bundles_post_ra>
// kernel: tpu_custom_call.1
= control target key start
LH: loop header
LB: loop body
LE: loop exit
PB: predicated region body
PF: predicated region fallthrough
CT: control target
= control target key end

     0   :  { %vm22_vm0 = vcmask 130048   ;;  %v63_v1 = vmov 0   ;;  %v16_v7 = vlaneseq  ;;  %vm49_vm2 = vcmask 7168   ;;  %s99_s0 = inlined_call_operand.vmem [shape: f32[8,16], index: 0, kind: input, shape index: {}]   ;;  %s100_s1 = inlined_call_operand.vmem [shape: s32[8,1], index: 1, kind: input, shape index: {}]   ;;  %s101_s2 = inlined_call_operand.vmem [shape: f32[8,1], index: 2, kind: input, shape index: {}]   ;;  %s102_s3 = inlined_call_operand.vmem [shape: f32[8,1], index: 3, kind: output, shape index: {}]  }
   0x1   :  { %v14_v0 = vld [vmem:[%s99_s0] sm:$0xff]  ;;  %56 = vset.pattern.permute.xlu0 %v63_v1 }
   0x2   :  { %v23_v2 = vsel %vm22_vm0, %v14_v0, -inf  ;;  %v15_v3 = vld [vmem:[%s100_s1] sm:$0xff]  ;;  %v17_v8 = vand.u32 127, %v16_v7 }
   0x3   :  { %24 = vmax.xlane.f32.xlu0 %v23_v2  ;;  %v47_v26 = vld [vmem:[%s101_s2] sm:$0xff] }
  0x19   :  { %19 = vperm.xlu0 %56, %v15_v3  }
  0x8c   :  { %v25_v4 = vpop.xlane.xlu0 %24 }
  0x8d   :  { %v26_v5 = vsub.f32 %v14_v0, %v25_v4 }
  0x8f   :  { %v27_v6 = vmul.f32 1.442695, %v26_v5 }
  0x91   :  { %57 = vpow2.f32 %v27_v6 }
  0x94   :  { %v20_v9 = vpop.permute.xlu0 %19 }
  0x95   :  { %vm21_vm1 = vcmp.eq.s32.totalorder %v17_v8, %v20_v9 }
  0x96   :  { %v34_v11 = vsel %vm21_vm1, %v14_v0, 0.0 }
  0x97   :  { %v35_v13 = vsel %vm22_vm0, %v34_v11, 0.0 }
  0x9e   :  { %v58_v10 = vpop.eup %57 }
  0x9f   :  { %v29_v12 = vsel %vm22_vm0, %v58_v10, 0.0 }
  0xa0   :  { %30 = vadd.xlane.f32.xlu1 %v29_v12 }
  0xa4   :  { %36 = vadd.xlane.f32.xlu1 %v35_v13 }
 0x129   :  { %v31_v14 = vpop.xlane.xlu1 %30 }
 0x12a   :  { %59 = vlog2.f32 %v31_v14 }
 0x12d   :  { %v37_v15 = vpop.xlane.xlu1 %36 }
 0x12e   :  { %v38_v18 = vsub.f32 %v37_v15, %v25_v4 }
 0x137   :  { %v60_v16 = vpop.eup %59 }
 0x138   :  { %v33_v17 = vmul.f32 0.6931472, %v60_v16 }
 0x13a   :  { %v39_v19 = vsub.f32 %v38_v18, %v33_v17 }
 0x13c   :  { %v40_v20 = vmul.f32 1.442695, %v39_v19 }
 0x13e   :  { %61 = vpow2.f32 %v40_v20 }
 0x14b   :  { %v62_v21 = vpop.eup %61 }
 0x14c   :  { %v42_v22 = vsub.f32 1.0, %v62_v21 }
 0x14e   :  { %v43_v23 = vmax.f32 %v42_v22, 0.0 }
 0x150   :  { %v44_v24 = vmul.f32 %v43_v23, %v43_v23 }
 0x152   :  { %v45_v25 = vsub.f32 0.0, %v44_v24 }
 0x154   :  { %v46_v27 = vmul.f32 %v45_v25, %v39_v19 }
 0x156   :  { %v48_v28 = vmul.f32 %v47_v26, %v46_v27 }
 0x158   :  { %50 = vst.msk [vmem:[%s102_s3] sm:$0xff] %vm49_vm2, %v48_v28 }

</bundles_post_ra>
